<compile_context>
chip_gen: v6e
topology: v6e:2x2x1
jax: 0.10.0
libtpu: 0.0.40
codegen_flags: <defaults>
</compile_context>

<pallas_src>
import numpy as np
import jax
import jax.numpy as jnp
from jax import lax
from jax.experimental import pallas as pl
from jax.experimental.pallas import tpu as pltpu


# ---------------------------------------------------------------------------------
# Kernel: one batch row per grid step.  H / hd are derived from the weight shapes.
# ---------------------------------------------------------------------------------
def self_attention_kernel(x_ref, wqkv_ref, wo_ref, bo_ref, o_ref):
    S, E = x_ref.shape                     # batch dim squeezed by the BlockSpec
    H, _, three_hd = wqkv_ref.shape
    hd = three_hd // 3

    dt = x_ref.dtype                       # MXU input dtype (f32 exact / bf16 optional)

    # Broadcast the (S, E) activations over heads once: leading-dim broadcast only,
    # a handful of small vreg copies, no lane/sublane shuffles.
    xh = jnp.broadcast_to(x_ref[...], (H, S, E))

    # Fused per-head QKV projection: ONE batched dot_general (contraction K = E).
    # No post-hoc per-head lane slicing / concatenation.
    qkv = lax.dot_general(xh, wqkv_ref[...],
                          (((2,), (1,)), ((0,), (0,))),
                          preferred_element_type=jnp.float32).astype(dt)   # (H, S, 3*hd)
    q = qkv[:, :, 0 * hd:1 * hd]
    k = qkv[:, :, 1 * hd:2 * hd]
    v = qkv[:, :, 2 * hd:3 * hd]

    # Attention scores batched over heads.  NOTE: no 1/sqrt(hd) scaling (matches ref).
    s = lax.dot_general(q, k, (((2,), (2,)), ((0,), (0,))),
                        preferred_element_type=jnp.float32)                # (H, S, S)
    m = jnp.max(s, axis=-1, keepdims=True)
    e = jnp.exp(s - m)
    p = e / jnp.sum(e, axis=-1, keepdims=True)      # exact softmax (f32 parity)

    # TODO(synk): auto_regressive=True post-softmax -inf masking branch not implemented.

    ctx = lax.dot_general(p.astype(dt), v, (((2,), (1,)), ((0,), (0,))),
                          preferred_element_type=jnp.float32).astype(dt)   # (H, S, hd)

    # Output projection without re-concatenating heads along lanes:
    # per-head (S,hd)@(hd,E) batched over H, then a cheap leading-axis sum (pure VALU).
    out_h = lax.dot_general(ctx, wo_ref[...], (((2,), (1,)), ((0,), (0,))),
                            preferred_element_type=jnp.float32)            # (H, S, E)
    out = jnp.sum(out_h, axis=0) + bo_ref[...]                             # (S,E)+(1,E)
    o_ref[...] = out.astype(o_ref.dtype)


# ---------------------------------------------------------------------------------
# One-time parameter packing (call at init, NOT per forward step).
# wq/wk/wv/wo are (in, out) == PyTorch weight.T; bo is (E,).
# ---------------------------------------------------------------------------------
def pack_self_attention_params(wq, wk, wv, wo, bo, num_heads, use_bf16=False):
    E = wq.shape[0]
    hd = E // num_heads

    def per_head(w):                       # (E_in, E_out) -> (H, E_in, hd)
        return w.reshape(E, num_heads, hd).transpose(1, 0, 2)

    wqkv_h = jnp.concatenate([per_head(wq), per_head(wk), per_head(wv)], axis=-1)
    wo_h = wo.reshape(num_heads, hd, E)    # rows of wo grouped by head
    wdt = jnp.bfloat16 if use_bf16 else jnp.float32
    return (wqkv_h.astype(wdt), wo_h.astype(wdt), bo.reshape(1, E).astype(jnp.float32))


def self_attention(x, params):
    """x: (B, S, E) f32; params from pack_self_attention_params."""
    wqkv_h, wo_h, bo2 = params
    B, S, E = x.shape
    H, _, three_hd = wqkv_h.shape
    hd = three_hd // 3
    x = x.astype(wqkv_h.dtype)             # bf16 path casts at the call boundary

    return pl.pallas_call(
        self_attention_kernel,
        out_shape=jax.ShapeDtypeStruct((B, S, E), jnp.float32),
        grid=(B,),
        in_specs=[
            pl.BlockSpec((None, S, E), lambda b: (b, 0, 0)),        # one batch row
            pl.BlockSpec((H, E, 3 * hd), lambda b: (0, 0, 0)),      # resident weights
            pl.BlockSpec((H, hd, E), lambda b: (0, 0, 0)),
            pl.BlockSpec((1, E), lambda b: (0, 0)),
        ],
        out_specs=pl.BlockSpec((None, S, E), lambda b: (b, 0, 0)),
        compiler_params=pltpu.CompilerParams(
            dimension_semantics=("parallel",)),                     # both TCs on v7x
    )(x, wqkv_h, wo_h, bo2)


# ---------------------------------------------------------------------------------
# Pure-JAX reference (mirrors the PyTorch module line by line) for verification.
# ---------------------------------------------------------------------------------
def self_attention_ref(x, wq, wk, wv, wo, bo, num_heads):
    B, S, E = x.shape
    hd = E // num_heads
    q = x @ wq
    k = x @ wk
    v = x @ wv

    def split(t):   # (B, S, E) -> (B, H, S, hd)
        return t.reshape(B, S, num_heads, hd).transpose(0, 2, 1, 3)

    q, k, v = split(q), split(k), split(v)
    s = jnp.einsum("bhqd,bhkd->bhqk", q, k)               # no 1/sqrt(hd) scaling
    p = jax.nn.softmax(s, axis=-1)
    ctx = jnp.einsum("bhqk,bhkd->bhqd", p, v)
    ctx = ctx.transpose(0, 2, 1, 3).reshape(B, S, E)
    return ctx @ wo + bo[None, None, :]


if __name__ == "__main__":
    B, S, E, H = 2, 8, 32, 8

    key = jax.random.PRNGKey(0)
    kx, kq, kk, kv, ko, kb = jax.random.split(key, 6)
    x = jax.random.normal(kx, (B, S, E), jnp.float32)
    wq = jax.random.normal(kq, (E, E), jnp.float32) * 0.1
    wk = jax.random.normal(kk, (E, E), jnp.float32) * 0.1
    wv = jax.random.normal(kv, (E, E), jnp.float32) * 0.1
    wo = jax.random.normal(ko, (E, E), jnp.float32) * 0.1
    bo = jax.random.normal(kb, (E,), jnp.float32) * 0.1

    ref = jax.block_until_ready(self_attention_ref(x, wq, wk, wv, wo, bo, H))

    # ---- default exact-f32 path: near-exact parity with the PyTorch module --------
    params = pack_self_attention_params(wq, wk, wv, wo, bo, H)       # done once (init)
    out = jax.block_until_ready(self_attention(x, params))
    assert out.shape == (B, S, E)
    assert np.isfinite(np.asarray(out)).all()
    np.testing.assert_allclose(np.asarray(out), np.asarray(ref), rtol=1e-4, atol=1e-4)

    # ---- optional bf16 MXU path (not bit-parity by design; loose check only) ------
    params_bf16 = pack_self_attention_params(wq, wk, wv, wo, bo, H, use_bf16=True)
    out_bf16 = jax.block_until_ready(self_attention(x, params_bf16))
    assert np.isfinite(np.asarray(out_bf16)).all()
    np.testing.assert_allclose(np.asarray(out_bf16), np.asarray(ref), rtol=2e-1, atol=2e-1)

    print("KERNEL_OK")
</pallas_src>

<mosaic_0001>
module attributes {stable_mosaic.version = 11 : i64} {
  func.func @self_attention_kernel(%arg0: i32, %arg1: memref<1x8x32xf32, #tpu.memory_space<vmem>>, %arg2: memref<8x32x12xf32, #tpu.memory_space<vmem>>, %arg3: memref<8x4x32xf32, #tpu.memory_space<vmem>>, %arg4: memref<1x32xf32, #tpu.memory_space<vmem>>, %arg5: memref<1x8x32xf32, #tpu.memory_space<vmem>>) attributes {dimension_semantics = [#tpu.dimension_semantics<parallel>], iteration_bounds = array<i64: 2>, scalar_prefetch = 0 : i64, scratch_operands = 0 : i64, tpu.core_type = #tpu.core_type<tc>, window_params = [{transform_indices = @transform_0, window_bounds = array<i64: 1, 8, 32>}, {pipeline_mode = #tpu.pipeline_mode<synchronous>, transform_indices = @transform_1, window_bounds = array<i64: 8, 32, 12>}, {pipeline_mode = #tpu.pipeline_mode<synchronous>, transform_indices = @transform_2, window_bounds = array<i64: 8, 4, 32>}, {pipeline_mode = #tpu.pipeline_mode<synchronous>, transform_indices = @transform_3, window_bounds = array<i64: 1, 32>}, {transform_indices = @transform_4, window_bounds = array<i64: 1, 8, 32>}]} {
    %c0 = arith.constant 0 : index
    %c0_0 = arith.constant 0 : index
    %c0_1 = arith.constant 0 : index
    %0 = vector.load %arg1[%c0, %c0_0, %c0_1] : memref<1x8x32xf32, #tpu.memory_space<vmem>>, vector<1x8x32xf32>
    %1 = vector.shape_cast %0 : vector<1x8x32xf32> to vector<8x32xf32>
    %2 = vector.shape_cast %1 : vector<8x32xf32> to vector<1x8x32xf32>
    %3 = vector.broadcast %2 : vector<1x8x32xf32> to vector<8x8x32xf32>
    %c0_2 = arith.constant 0 : index
    %c0_3 = arith.constant 0 : index
    %c0_4 = arith.constant 0 : index
    %4 = vector.load %arg2[%c0_2, %c0_3, %c0_4] : memref<8x32x12xf32, #tpu.memory_space<vmem>>, vector<8x32x12xf32>
    %cst = arith.constant dense<0.000000e+00> : vector<8x8x12xf32>
    %5 = tpu.matmul %3, %4, %cst {dimension_numbers = #tpu.dot_dimension_numbers<[2], [1], [1], [2], [0, 0, 0, 1, 1, 2], [0], [0]>} : vector<8x8x32xf32>, vector<8x32x12xf32>, vector<8x8x12xf32> -> vector<8x8x12xf32>
    %6 = vector.extract_strided_slice %5 {offsets = [0, 0, 0], sizes = [8, 8, 4], strides = [1, 1, 1]} : vector<8x8x12xf32> to vector<8x8x4xf32>
    %7 = vector.extract_strided_slice %5 {offsets = [0, 0, 4], sizes = [8, 8, 4], strides = [1, 1, 1]} : vector<8x8x12xf32> to vector<8x8x4xf32>
    %8 = vector.extract_strided_slice %5 {offsets = [0, 0, 8], sizes = [8, 8, 4], strides = [1, 1, 1]} : vector<8x8x12xf32> to vector<8x8x4xf32>
    %cst_5 = arith.constant dense<0.000000e+00> : vector<8x8x8xf32>
    %9 = tpu.matmul %6, %7, %cst_5 {dimension_numbers = #tpu.dot_dimension_numbers<[2], [2], [1], [1], [0, 0, 0, 1, 1, 1], [0], [0]>} : vector<8x8x4xf32>, vector<8x8x4xf32>, vector<8x8x8xf32> -> vector<8x8x8xf32>
    %cst_6 = arith.constant dense<0xFF800000> : vector<8x8xf32>
    %10 = vector.multi_reduction <maximumf>, %9, %cst_6 [2] : vector<8x8x8xf32> to vector<8x8xf32>
    %11 = vector.shape_cast %10 : vector<8x8xf32> to vector<8x8x1xf32>
    %12 = vector.broadcast %11 : vector<8x8x1xf32> to vector<8x8x8xf32>
    %13 = arith.subf %9, %12 : vector<8x8x8xf32>
    %14 = math.exp %13 : vector<8x8x8xf32>
    %cst_7 = arith.constant dense<0.000000e+00> : vector<8x8xf32>
    %15 = vector.multi_reduction <add>, %14, %cst_7 [2] : vector<8x8x8xf32> to vector<8x8xf32>
    %16 = vector.shape_cast %15 : vector<8x8xf32> to vector<8x8x1xf32>
    %17 = vector.broadcast %16 : vector<8x8x1xf32> to vector<8x8x8xf32>
    %18 = arith.divf %14, %17 : vector<8x8x8xf32>
    %cst_8 = arith.constant dense<0.000000e+00> : vector<8x8x4xf32>
    %19 = tpu.matmul %18, %8, %cst_8 {dimension_numbers = #tpu.dot_dimension_numbers<[2], [1], [1], [2], [0, 0, 0, 1, 1, 2], [0], [0]>} : vector<8x8x8xf32>, vector<8x8x4xf32>, vector<8x8x4xf32> -> vector<8x8x4xf32>
    %c0_9 = arith.constant 0 : index
    %c0_10 = arith.constant 0 : index
    %c0_11 = arith.constant 0 : index
    %20 = vector.load %arg3[%c0_9, %c0_10, %c0_11] : memref<8x4x32xf32, #tpu.memory_space<vmem>>, vector<8x4x32xf32>
    %cst_12 = arith.constant dense<0.000000e+00> : vector<8x8x32xf32>
    %21 = tpu.matmul %19, %20, %cst_12 {dimension_numbers = #tpu.dot_dimension_numbers<[2], [1], [1], [2], [0, 0, 0, 1, 1, 2], [0], [0]>} : vector<8x8x4xf32>, vector<8x4x32xf32>, vector<8x8x32xf32> -> vector<8x8x32xf32>
    %cst_13 = arith.constant dense<0.000000e+00> : vector<8x32xf32>
    %22 = vector.multi_reduction <add>, %21, %cst_13 [0] : vector<8x8x32xf32> to vector<8x32xf32>
    %c0_14 = arith.constant 0 : index
    %c0_15 = arith.constant 0 : index
    %23 = vector.load %arg4[%c0_14, %c0_15] : memref<1x32xf32, #tpu.memory_space<vmem>>, vector<1x32xf32>
    %24 = vector.broadcast %23 : vector<1x32xf32> to vector<8x32xf32>
    %25 = arith.addf %22, %24 : vector<8x32xf32>
    %c0_16 = arith.constant 0 : index
    %c0_17 = arith.constant 0 : index
    %c0_18 = arith.constant 0 : index
    %26 = vector.load %arg5[%c0_16, %c0_17, %c0_18] : memref<1x8x32xf32, #tpu.memory_space<vmem>>, vector<1x8x32xf32>
    %27 = vector.shape_cast %26 : vector<1x8x32xf32> to vector<8x32xf32>
    %28 = vector.shape_cast %25 : vector<8x32xf32> to vector<1x8x32xf32>
    tpu.vector_store %arg5[%c0_16, %c0_17, %c0_18], %28 {strides = array<i32>} : memref<1x8x32xf32, #tpu.memory_space<vmem>>, vector<1x8x32xf32>,
    return
  }
  func.func @transform_0(%arg0: i32) -> (i32, i32, i32) {
    %c0_i32 = arith.constant 0 : i32
    %c0_i32_0 = arith.constant 0 : i32
    %c0_i32_1 = arith.constant 0 : i32
    return %arg0, %c0_i32, %c0_i32_0 : i32, i32, i32
  }
  func.func @transform_1(%arg0: i32) -> (i32, i32, i32) {
    %c0_i32 = arith.constant 0 : i32
    %c0_i32_0 = arith.constant 0 : i32
    %c0_i32_1 = arith.constant 0 : i32
    %c0_i32_2 = arith.constant 0 : i32
    return %c0_i32, %c0_i32_0, %c0_i32_1 : i32, i32, i32
  }
  func.func @transform_2(%arg0: i32) -> (i32, i32, i32) {
    %c0_i32 = arith.constant 0 : i32
    %c0_i32_0 = arith.constant 0 : i32
    %c0_i32_1 = arith.constant 0 : i32
    %c0_i32_2 = arith.constant 0 : i32
    return %c0_i32, %c0_i32_0, %c0_i32_1 : i32, i32, i32
  }
  func.func @transform_3(%arg0: i32) -> (i32, i32) {
    %c0_i32 = arith.constant 0 : i32
    %c0_i32_0 = arith.constant 0 : i32
    %c0_i32_1 = arith.constant 0 : i32
    return %c0_i32, %c0_i32_0 : i32, i32
  }
  func.func @transform_4(%arg0: i32) -> (i32, i32, i32) {
    %c0_i32 = arith.constant 0 : i32
    %c0_i32_0 = arith.constant 0 : i32
    %c0_i32_1 = arith.constant 0 : i32
    return %arg0, %c0_i32, %c0_i32_0 : i32, i32, i32
  }
}

</mosaic_0001>

<bundles_post_ra>
// kernel: tpu_custom_call.1
= control target key start
LH: loop header
LB: loop body
LE: loop exit
PB: predicated region body
PF: predicated region fallthrough
CT: control target
= control target key end

     0   :  { %9 = vsyncpa [#allocation3], 0  ;;  %s3817_s0 = inlined_call_operand.vmem [shape: f32[2,8,32], index: 0, kind: input, shape index: {}]   ;;  %s3818_s1 = inlined_call_operand.vmem [shape: f32[8,32,12], index: 1, kind: input, shape index: {}]   ;;  %s3819_s2 = inlined_call_operand.vmem [shape: f32[8,4,32], index: 2, kind: input, shape index: {}]   ;;  %s3820_s3 = inlined_call_operand.vmem [shape: f32[1,32], index: 3, kind: input, shape index: {}]   ;;  %s3821_s4 = inlined_call_operand.hbm [shape: f32[2,8,32], index: 4, kind: output, shape index: {}]  }
   0x1   :  { %11 = vsyncpa [#allocation3 + $0x1], 0  ;;  %s3340_s15 = smov 0   ;;  %s3342_s16 = smov 0  }
   0x2   :  { %s3344_s17 = smov 0   ;;  %s3346_s18 = smov 0  }
   0x3 LB: > { %s3361_s19 = sadd.s32 4294967295, %s3308_s18   ;;  %s2818_s20 = sadd.s32 4294967294, %s3308_s18   ;;  %s3308_s18 = sphi %s3346_s18, %s3827_s18   ;;  %s3304_s17 = sphi %s3344_s17, %s3826_s17   ;;  %s3300_s16 = sphi %s3342_s16, %s3825_s16   ;;  %s3296_s15 = sphi %s3340_s15, %s3824_s15  }
   0x4   : > { %s3365_s21 = sadd.s32 1, %s3308_s18   ;;  %s113_s22 = sadd.s32 1, %s3304_s17 }
   0x5   : > { %s110_s23 = ssub.s32 %s3308_s18, %s3365_s21  ;;  %p123_p0 = scmp.ne.s32.totalorder %s3304_s17, %s3300_s16 }
   0x6   : > { %p111_p1 = scmp.eq.s32.totalorder %s110_s23, 0  ;;  %p124_p2 = scmp.eq.s32.totalorder %s3361_s19, 1 }
   0x7   : > { %p129_p3 = scmp.ne.s32.totalorder %s3300_s16, %s3296_s15  ;;  %p130_p4 = scmp.eq.s32.totalorder %s2818_s20, 1 }
   0x8   : > { %s3376_s24 = scalar_select %p111_p1, %s3304_s17, %s113_s22  }
   0x9   : > { %p3378_p5 = por %p124_p2, %p123_p0  ;;  %p3382_p6 = por %p130_p4, %p129_p3 }
   0xa   : > { %p2821_p7 = scmp.ge.s32.totalorder %s3308_s18, 1  ;;  %p164_p8 = scmp.lt.s32.totalorder %s3308_s18, 3 }
   0xc   : > { %p165_p9 = pnand %p2821_p7, %p164_p8 }
   0xd   : > { %p189_p10 = scmp.lt.s32.totalorder (!%p165_p9), %s3361_s19, 1  ;;  %s3313_s29 = smov (!%p165_p9), 120  }
   0xe   : > { %168 = sbr.rel (%p165_p9) target bundleno = 1282 (0x502), region = 36  ;;  %s2874_s7 = sshll.u32 (!%p165_p9), %s3361_s19, 7 }
   0xf   : > { %s2757_s12 = scalar_lea.hbm (!%p165_p9), %s3821_s4, %s2874_s7  ;;  %s3314_s20 = smov (!%p165_p9), [#allocation2]  }
  0x10   : > { %s3252_s22 = sshll.u32 (!%p165_p9), %s3314_s20, 4  ;;  %s3253_s22 = int_to_ptr.vmem [resolvable:$false] %s3252_s22 }
  0x13   : > { %v197_v0 = vld [vmem:[%s3818_s1 + $0x18] sm:$0xff]  ;;  %v3310_v2 = vmov 0.0   ;;  %v196_v3 = vld [vmem:[%s3818_s1 + $0x10] sm:$0xff]  ;;  %s190_s9 = scalar_select %p189_p10, %s3361_s19, 1  ;;  %v195_v5 = vld [vmem:[%s3818_s1 + $0x8] sm:$0xff]  ;;  %vm226_vm0 = vcmask 261120  }
  0x14   : > { %v201_v1 = vld [vmem:[%s3818_s1 + $0x38] sm:$0xff]  ;;  %2965 = vmatprep.subr.mxu0 %v3310_v2  ;;  %2976 = vmatprep.subr.mxu1 %v3310_v2  ;;  %v200_v4 = vld [vmem:[%s3818_s1 + $0x30] sm:$0xff]  ;;  %v199_v6 = vld [vmem:[%s3818_s1 + $0x28] sm:$0xff]  ;;  %vm3311_vm1 = vmmov 0   ;;  %vm793_vm2 = vcmask 31744   ;;  %vm1407_vm3 = vcmask 64512  }
  0x15   : > { %2966 = vmatpush3.msra.mxu0 %v197_v0  ;;  %2977 = vmatpush3.msra.mxu1 %v201_v1  ;;  %s2823_s14 = sshll.u32 %s190_s9, 3  ;;  %v194_v7 = vld [vmem:[%s3818_s1] sm:$0xff]  ;;  %v205_v10 = vld [vmem:[%s3818_s1 + $0x58] sm:$0xff]  ;;  %v204_v12 = vld [vmem:[%s3818_s1 + $0x50] sm:$0xff]  ;;  %vm2115_vm4 = vcmask 1043456   ;;  %s3254_s19 = scalar_lea.vmem %s3253_s22, 256 }
  0x16   : > { %2967 = vmatprep.subr.mxu0 %v3310_v2  ;;  %2978 = vmatprep.subr.mxu1 %v3310_v2  ;;  %s192_s28 = scalar_lea.vmem %s3817_s0, %s2823_s14  ;;  %v198_v8 = vld [vmem:[%s3818_s1 + $0x20] sm:$0xff]  ;;  %v209_v11 = vld [vmem:[%s3818_s1 + $0x78] sm:$0xff]  ;;  %v208_v13 = vld [vmem:[%s3818_s1 + $0x70] sm:$0xff] }
  0x17   : > { %2968 = vmatpush3.msra.mxu0 %v196_v3  ;;  %2979 = vmatpush3.msra.mxu1 %v200_v4  ;;  %v3423_v9 = vld [vmem:[%s192_s28] sm:$0xff]  ;;  %v203_v14 = vld [vmem:[%s3818_s1 + $0x48] sm:$0xff]  ;;  %v213_v18 = vld [vmem:[%s3818_s1 + $0x98] sm:$0xff]  ;;  %s3312_s28 = smov 124  }
  0x18   : > { %2969 = vmatprep.subr.mxu0 %v3310_v2  ;;  %2980 = vmatprep.subr.mxu1 %v3310_v2  ;;  %v207_v15 = vld [vmem:[%s3818_s1 + $0x68] sm:$0xff]  ;;  %v202_v16 = vld [vmem:[%s3818_s1 + $0x40] sm:$0xff]  ;;  %v217_v19 = vld [vmem:[%s3818_s1 + $0xb8] sm:$0xff] }
  0x19   : > { %2970 = vmatpush3.msra.mxu0 %v195_v5  ;;  %2981 = vmatpush3.msra.mxu1 %v199_v6  ;;  %v206_v17 = vld [vmem:[%s3818_s1 + $0x60] sm:$0xff]  ;;  %v212_v20 = vld [vmem:[%s3818_s1 + $0x90] sm:$0xff]  ;;  %v211_v22 = vld [vmem:[%s3818_s1 + $0x88] sm:$0xff] }
  0x1a   : > { %2971 = vmatprep.subr.mxu0 %v3310_v2  ;;  %2982 = vmatprep.subr.mxu1 %v3310_v2  ;;  %v216_v21 = vld [vmem:[%s3818_s1 + $0xb0] sm:$0xff]  ;;  %v215_v23 = vld [vmem:[%s3818_s1 + $0xa8] sm:$0xff]  ;;  %v210_v24 = vld [vmem:[%s3818_s1 + $0x80] sm:$0xff] }
  0x1b   : > { %2972 = vmatpush3.msra.mxu0 %v194_v7  ;;  %2973 = vmatprep.mubr.msk.f32.mxu0 %vm3311_vm1, %v3310_v2  ;;  %v214_v25 = vld [vmem:[%s3818_s1 + $0xa0] sm:$0xff]  ;;  %v221_v26 = vld [vmem:[%s3818_s1 + $0xd8] sm:$0xff]  ;;  %v220_v28 = vld [vmem:[%s3818_s1 + $0xd0] sm:$0xff] }
  0x1c   : > { %2983 = vmatpush3.msra.mxu1 %v198_v8  ;;  %2974 = vmatmul.mubr.msk.f32.vlgmr.msra.gmra.mxu0 %vm226_vm0, %v3423_v9  ;;  %v225_v27 = vld [vmem:[%s3818_s1 + $0xf8] sm:$0xff]  ;;  %v224_v29 = vld [vmem:[%s3818_s1 + $0xf0] sm:$0xff]  ;;  %v219_v30 = vld [vmem:[%s3818_s1 + $0xc8] sm:$0xff] }
  0x1d   : > { %2984 = vmatprep.mubr.msk.f32.mxu1 %vm3311_vm1, %v3310_v2  ;;  %2987 = vmatprep.subr.mxu0 %v3310_v2  ;;  %v223_v31 = vld [vmem:[%s3818_s1 + $0xe8] sm:$0xff]  ;;  %v218_v32 = vld [vmem:[%s3818_s1 + $0xc0] sm:$0xff] }
  0x1e   : > { %2998 = vmatprep.subr.mxu1 %v3310_v2  ;;  %2985 = vmatmul.mubr.msk.f32.vlgmr.msra.gmra.mxu1 %vm226_vm0, %v3423_v9  ;;  %v222_v33 = vld [vmem:[%s3818_s1 + $0xe0] sm:$0xff] }
  0x1f   : > { %2988 = vmatpush3.msra.mxu0 %v205_v10  ;;  %2999 = vmatpush3.msra.mxu1 %v209_v11 }
  0x20   : > { %2989 = vmatprep.subr.mxu0 %v3310_v2  ;;  %3000 = vmatprep.subr.mxu1 %v3310_v2 }
  0x21   : > { %2990 = vmatpush3.msra.mxu0 %v204_v12  ;;  %3001 = vmatpush3.msra.mxu1 %v208_v13 }
  0x22   : > { %2991 = vmatprep.subr.mxu0 %v3310_v2  ;;  %3002 = vmatprep.subr.mxu1 %v3310_v2 }
  0x23   : > { %2992 = vmatpush3.msra.mxu0 %v203_v14  ;;  %3003 = vmatpush3.msra.mxu1 %v207_v15 }
  0x24   : > { %2993 = vmatprep.subr.mxu0 %v3310_v2  ;;  %3004 = vmatprep.subr.mxu1 %v3310_v2 }
  0x25   : > { %2994 = vmatpush3.msra.mxu0 %v202_v16  ;;  %2995 = vmatprep.mubr.msk.f32.mxu0 %vm3311_vm1, %v3310_v2 }
  0x26   : > { %3005 = vmatpush3.msra.mxu1 %v206_v17  ;;  %2996 = vmatmul.mubr.msk.f32.vlgmr.msra.gmra.mxu0 %vm226_vm0, %v3423_v9 }
  0x27   : > { %3006 = vmatprep.mubr.msk.f32.mxu1 %vm3311_vm1, %v3310_v2  ;;  %3009 = vmatprep.subr.mxu0 %v3310_v2 }
  0x28   : > { %3020 = vmatprep.subr.mxu1 %v3310_v2  ;;  %3007 = vmatmul.mubr.msk.f32.vlgmr.msra.gmra.mxu1 %vm226_vm0, %v3423_v9 }
  0x29   : > { %3010 = vmatpush3.msra.mxu0 %v213_v18  ;;  %3021 = vmatpush3.msra.mxu1 %v217_v19 }
  0x2a   : > { %3011 = vmatprep.subr.mxu0 %v3310_v2  ;;  %3022 = vmatprep.subr.mxu1 %v3310_v2 }
  0x2b   : > { %3012 = vmatpush3.msra.mxu0 %v212_v20  ;;  %3023 = vmatpush3.msra.mxu1 %v216_v21 }
  0x2c   : > { %3013 = vmatprep.subr.mxu0 %v3310_v2  ;;  %3024 = vmatprep.subr.mxu1 %v3310_v2 }
  0x2d   : > { %3014 = vmatpush3.msra.mxu0 %v211_v22  ;;  %3025 = vmatpush3.msra.mxu1 %v215_v23 }
  0x2e   : > { %3015 = vmatprep.subr.mxu0 %v3310_v2  ;;  %3026 = vmatprep.subr.mxu1 %v3310_v2 }
  0x2f   : > { %3016 = vmatpush3.msra.mxu0 %v210_v24  ;;  %3017 = vmatprep.mubr.msk.f32.mxu0 %vm3311_vm1, %v3310_v2 }
  0x30   : > { %3027 = vmatpush3.msra.mxu1 %v214_v25  ;;  %3028 = vmatprep.mubr.msk.f32.mxu1 %vm3311_vm1, %v3310_v2 }
  0x31   : > { %3018 = vmatmul.mubr.msk.f32.vlgmr.msra.gmra.mxu0 %vm226_vm0, %v3423_v9  ;;  %3029 = vmatmul.mubr.msk.f32.vlgmr.msra.gmra.mxu1 %vm226_vm0, %v3423_v9 }
  0x32   : > { %3031 = vmatprep.subr.mxu0 %v3310_v2  ;;  %3042 = vmatprep.subr.mxu1 %v3310_v2 }
  0x33   : > { %3032 = vmatpush3.msra.mxu0 %v221_v26  ;;  %3043 = vmatpush3.msra.mxu1 %v225_v27 }
  0x34   : > { %3033 = vmatprep.subr.mxu0 %v3310_v2  ;;  %3044 = vmatprep.subr.mxu1 %v3310_v2 }
  0x35   : > { %3034 = vmatpush3.msra.mxu0 %v220_v28  ;;  %3045 = vmatpush3.msra.mxu1 %v224_v29 }
  0x36   : > { %3035 = vmatprep.subr.mxu0 %v3310_v2  ;;  %3046 = vmatprep.subr.mxu1 %v3310_v2 }
  0x37   : > { %3036 = vmatpush3.msra.mxu0 %v219_v30  ;;  %3047 = vmatpush3.msra.mxu1 %v223_v31 }
  0x38   : > { %3037 = vmatprep.subr.mxu0 %v3310_v2  ;;  %3048 = vmatprep.subr.mxu1 %v3310_v2 }
  0x39   : > { %3038 = vmatpush3.msra.mxu0 %v218_v32  ;;  %3039 = vmatprep.mubr.msk.f32.mxu0 %vm3311_vm1, %v3310_v2 }
  0x3a   : > { %3049 = vmatpush3.msra.mxu1 %v222_v33  ;;  %3050 = vmatprep.mubr.msk.f32.mxu1 %vm3311_vm1, %v3310_v2 }
  0x3b   : > { %3040 = vmatmul.mubr.msk.f32.vlgmr.msra.gmra.mxu0 %vm226_vm0, %v3423_v9  ;;  %3051 = vmatmul.mubr.msk.f32.vlgmr.msra.gmra.mxu1 %vm226_vm0, %v3423_v9 }
  0x3c   : > { %3053 = vmatprep.subr.mxu0 %v3310_v2  ;;  %3055 = vmatprep.mubr.msk.f32.mxu0 %vm3311_vm1, %v3310_v2 }
  0x3d   : > { %3058 = vmatprep.subr.mxu1 %v3310_v2  ;;  %3060 = vmatprep.mubr.msk.f32.mxu1 %vm3311_vm1, %v3310_v2 }
  0xdc   : > { %v3561_v34 = vpop.f32.mrf.mxu0 }
  0xdd   : > { %791 = vrot.lane.b32.xlu0 %v3561_v34, %s3312_s28 }
  0xde   : > { %v3564_v35 = vpop.f32.mrf.mxu1  ;;  %v2975_v36 = vpop.f32.mrf.mxu0 }
  0xe0   : > { %v2986_v37 = vpop.f32.mrf.mxu1 }
  0xe1   : > { %869 = vrot.lane.b32.xlu0 %v3564_v35, %s3312_s28 }
  0xe6   : > { %v3567_v38 = vpop.f32.mrf.mxu0 }
  0xe7   : > { %946 = vrot.lane.b32.xlu1 %v3567_v38, %s3312_s28 }
  0xe8   : > { %v3570_v39 = vpop.f32.mrf.mxu1  ;;  %v2997_v40 = vpop.f32.mrf.mxu0 }
  0xea   : > { %v3008_v41 = vpop.f32.mrf.mxu1 }
  0xeb   : > { %1023 = vrot.lane.b32.xlu1 %v3570_v39, %s3312_s28 }
  0xf1   : > { %v3573_v42 = vpop.f32.mrf.mxu0  ;;  %v3575_v43 = vpop.f32.mrf.mxu1 }
  0xf2   : > { %1177 = vrot.lane.b32.xlu1 %v3575_v43, %s3312_s28  ;;  %1100 = vrot.lane.b32.xlu0 %v3573_v42, %s3312_s28 }
  0xf3   : > { %v3019_v44 = vpop.f32.mrf.mxu0  ;;  %v3030_v45 = vpop.f32.mrf.mxu1 }
  0xfb   : > { %v3579_v46 = vpop.f32.mrf.mxu0  ;;  %v3581_v47 = vpop.f32.mrf.mxu1 }
  0xfc   : > { %1331 = vrot.lane.b32.xlu1 %v3581_v47, %s3312_s28  ;;  %1254 = vrot.lane.b32.xlu0 %v3579_v46, %s3312_s28 }
  0xfd   : > { %v3041_v48 = vpop.f32.mrf.mxu0  ;;  %v3052_v49 = vpop.f32.mrf.mxu1 }
 0x14f   : > { %v792_v50 = vpop.permute.xlu0 %791 }
 0x150   : > { %3054 = vmatpush3.xpose.msk.msra.mxu0 %vm793_vm2, %v792_v50 }
 0x151   : > { %3063 = vmatprep.subr.mxu0 %v3310_v2 }
 0x153   : > { %3056 = vmatmul.mubr.msk.f32.vlgmr.msra.gmra.mxu0 %vm793_vm2, %v3561_v34  ;;  %v870_v51 = vpop.permute.xlu0 %869 }
 0x154   : > { %3059 = vmatpush3.xpose.msk.msra.mxu1 %vm793_vm2, %v870_v51  ;;  %3065 = vmatprep.mubr.msk.f32.mxu0 %vm3311_vm1, %v3310_v2 }
 0x155   : > { %3068 = vmatprep.subr.mxu1 %v3310_v2 }
 0x157   : > { %3061 = vmatmul.mubr.msk.f32.vlgmr.msra.gmra.mxu1 %vm793_vm2, %v3564_v35 }
 0x158   : > { %3070 = vmatprep.mubr.msk.f32.mxu1 %vm3311_vm1, %v3310_v2 }
 0x159   : > { %v947_v52 = vpop.permute.xlu1 %946 }
 0x15a   : > { %3064 = vmatpush3.xpose.msk.msra.mxu0 %vm793_vm2, %v947_v52 }
 0x15b   : > { %3073 = vmatprep.subr.mxu0 %v3310_v2 }
 0x15d   : > { %3066 = vmatmul.mubr.msk.f32.vlgmr.msra.gmra.mxu0 %vm793_vm2, %v3567_v38  ;;  %v1024_v53 = vpop.permute.xlu1 %1023 }
 0x15e   : > { %3069 = vmatpush3.xpose.msk.msra.mxu1 %vm793_vm2, %v1024_v53  ;;  %3075 = vmatprep.mubr.msk.f32.mxu0 %vm3311_vm1, %v3310_v2 }
 0x15f   : > { %3078 = vmatprep.subr.mxu1 %v3310_v2 }
 0x161   : > { %3071 = vmatmul.mubr.msk.f32.vlgmr.msra.gmra.mxu1 %vm793_vm2, %v3570_v39 }
 0x162   : > { %3080 = vmatprep.mubr.msk.f32.mxu1 %vm3311_vm1, %v3310_v2 }
 0x164   : > { %v1178_v54 = vpop.permute.xlu1 %1177  ;;  %v1101_v55 = vpop.permute.xlu0 %1100 }
 0x165   : > { %3074 = vmatpush3.xpose.msk.msra.mxu0 %vm793_vm2, %v1101_v55  ;;  %3079 = vmatpush3.xpose.msk.msra.mxu1 %vm793_vm2, %v1178_v54 }
 0x166   : > { %3088 = vmatprep.subr.mxu1 %v3310_v2  ;;  %3083 = vmatprep.subr.mxu0 %v3310_v2 }
 0x168   : > { %3076 = vmatmul.mubr.msk.f32.vlgmr.msra.gmra.mxu0 %vm793_vm2, %v3573_v42  ;;  %3081 = vmatmul.mubr.msk.f32.vlgmr.msra.gmra.mxu1 %vm793_vm2, %v3575_v43 }
 0x169   : > { %3085 = vmatprep.mubr.msk.f32.mxu0 %vm3311_vm1, %v3310_v2  ;;  %3090 = vmatprep.mubr.msk.f32.mxu1 %vm3311_vm1, %v3310_v2 }
 0x16e   : > { %v1332_v56 = vpop.permute.xlu1 %1331  ;;  %v1255_v57 = vpop.permute.xlu0 %1254 }
 0x16f   : > { %3084 = vmatpush3.xpose.msk.msra.mxu0 %vm793_vm2, %v1255_v57  ;;  %3089 = vmatpush3.xpose.msk.msra.mxu1 %vm793_vm2, %v1332_v56 }
 0x170   : > { %3093 = vmatprep.subr.mxu0 %v3310_v2  ;;  %3098 = vmatprep.subr.mxu1 %v3310_v2 }
 0x172   : > { %3086 = vmatmul.mubr.msk.f32.vlgmr.msra.gmra.mxu0 %vm793_vm2, %v3579_v46  ;;  %3091 = vmatmul.mubr.msk.f32.vlgmr.msra.gmra.mxu1 %vm793_vm2, %v3581_v47 }
 0x173   : > { %3095 = vmatprep.mubr.msk.f32.mxu0 %vm3311_vm1, %v3310_v2  ;;  %3100 = vmatprep.mubr.msk.f32.mxu1 %vm3311_vm1, %v3310_v2 }
 0x213   : > { %v864_v58 = vpop.f32.mrf.mxu0 }
 0x214   : > { %v1408_v59 = vsel %vm1407_vm3, %v864_v58, -inf }
 0x215   : > { %1409 = vmax.xlane.f32.xlu0 %v1408_v59  ;;  %v3057_v60 = vpop.f32.mrf.mxu0 }
 0x217   : > { %v941_v61 = vpop.f32.mrf.mxu1 }
 0x218   : > { %v1411_v62 = vsel %vm1407_vm3, %v941_v61, -inf }
 0x219   : > { %v3062_v63 = vpop.f32.mrf.mxu1  ;;  %1412 = vmax.xlane.f32.xlu1 %v1411_v62 }
 0x21d   : > { %v1018_v0 = vpop.f32.mrf.mxu0 }
 0x21e   : > { %v1414_v1 = vsel %vm1407_vm3, %v1018_v0, -inf }
 0x21f   : > { %1415 = vmax.xlane.f32.xlu0 %v1414_v1  ;;  %v3067_v3 = vpop.f32.mrf.mxu0 }
 0x221   : > { %v1095_v4 = vpop.f32.mrf.mxu1 }
 0x222   : > { %v1417_v5 = vsel %vm1407_vm3, %v1095_v4, -inf }
 0x223   : > { %v3072_v6 = vpop.f32.mrf.mxu1  ;;  %1418 = vmax.xlane.f32.xlu0 %v1417_v5 }
 0x228   : > { %v1172_v7 = vpop.f32.mrf.mxu0  ;;  %v1249_v8 = vpop.f32.mrf.mxu1 }
 0x229   : > { %v1423_v9 = vsel %vm1407_vm3, %v1249_v8, -inf  ;;  %v1420_v10 = vsel %vm1407_vm3, %v1172_v7, -inf }
 0x22a   : > { %v3082_v11 = vpop.f32.mrf.mxu1  ;;  %1424 = vmax.xlane.f32.xlu0 %v1423_v9  ;;  %1421 = vmax.xlane.f32.xlu1 %v1420_v10  ;;  %v3077_v12 = vpop.f32.mrf.mxu0 }
 0x232   : > { %v1326_v13 = vpop.f32.mrf.mxu0  ;;  %v1403_v14 = vpop.f32.mrf.mxu1 }
 0x233   : > { %v1429_v15 = vsel %vm1407_vm3, %v1403_v14, -inf  ;;  %v1426_v16 = vsel %vm1407_vm3, %v1326_v13, -inf }
 0x234   : > { %v3092_v17 = vpop.f32.mrf.mxu1  ;;  %1430 = vmax.xlane.f32.xlu0 %v1429_v15  ;;  %1427 = vmax.xlane.f32.xlu1 %v1426_v16  ;;  %v3087_v18 = vpop.f32.mrf.mxu0 }
 0x245   : > { %1496 = vrot.lane.b32.xlu1 %v3561_v34, %s3313_s29 }
 0x249   : > { %1648 = vrot.lane.b32.xlu1 %v3567_v38, %s3313_s29 }
 0x24a   : > { %1572 = vrot.lane.b32.xlu0 %v3564_v35, %s3313_s29 }
 0x24d   : > { %1724 = vrot.lane.b32.xlu1 %v3570_v39, %s3313_s29 }
 0x24e   : > { %1800 = vrot.lane.b32.xlu0 %v3573_v42, %s3313_s29 }
 0x251   : > { %1876 = vrot.lane.b32.xlu1 %v3575_v43, %s3313_s29 }
 0x29e   : > { %v1410_v19 = vpop.xlane.xlu0 %1409 }
 0x29f   : > { %v1432_v20 = vsub.f32 %v864_v58, %v1410_v19 }
 0x2a1   : > { %v1440_v21 = vmul.f32 1.442695, %v1432_v20 }
 0x2a2   : > { %v1413_v22 = vpop.xlane.xlu1 %1412 }
 0x2a3   : > { %3216 = vpow2.f32 %v1440_v21  ;;  %v1433_v23 = vsub.f32 %v941_v61, %v1413_v22 }
 0x2a5   : > { %v1442_v24 = vmul.f32 1.442695, %v1433_v23 }
 0x2a7   : > { %3218 = vpow2.f32 %v1442_v24 }
 0x2a8   : > { %v1416_v25 = vpop.xlane.xlu0 %1415 }
 0x2a9   : > { %v1434_v26 = vsub.f32 %v1018_v0, %v1416_v25 }
 0x2ab   : > { %v1444_v27 = vmul.f32 1.442695, %v1434_v26 }
 0x2ac   : > { %v1419_v28 = vpop.xlane.xlu0 %1418 }
 0x2ad   : > { %3220 = vpow2.f32 %v1444_v27  ;;  %v1435_v29 = vsub.f32 %v1095_v4, %v1419_v28  ;;  %v2104_v28 = vld [vmem:[%s3819_s2] sm:$0xf] }
 0x2af   : > { %v1446_v30 = vmul.f32 1.442695, %v1435_v29  ;;  %v2105_v29 = vld [vmem:[%s3819_s2 + $0x4] sm:$0xf] }
 0x2b0   : > { %v3217_v31 = vpop.eup %3216 }
 0x2b1   : > { %3222 = vpow2.f32 %v1446_v30  ;;  %v1456_v32 = vsel %vm1407_vm3, %v3217_v31, 0.0  ;;  %v2106_v30 = vld [vmem:[%s3819_s2 + $0x8] sm:$0xf] }
 0x2b2   : > { %1457 = vadd.xlane.f32.xlu1 %v1456_v32 }
 0x2b3   : > { %v1425_v33 = vpop.xlane.xlu0 %1424  ;;  %v1422_v34 = vpop.xlane.xlu1 %1421 }
 0x2b4   : > { %v3219_v35 = vpop.eup %3218  ;;  %v1437_v36 = vsub.f32 %v1249_v8, %v1425_v33  ;;  %v1436_v37 = vsub.f32 %v1172_v7, %v1422_v34  ;;  %v2107_v33 = vld [vmem:[%s3819_s2 + $0xc] sm:$0xf] }
 0x2b5   : > { %v1459_v38 = vsel %vm1407_vm3, %v3219_v35, 0.0 }
 0x2b6   : > { %v1450_v39 = vmul.f32 1.442695, %v1437_v36  ;;  %v1448_v40 = vmul.f32 1.442695, %v1436_v37  ;;  %1460 = vadd.xlane.f32.xlu0 %v1459_v38  ;;  %v2108_v36 = vld [vmem:[%s3819_s2 + $0x10] sm:$0xf] }
 0x2b8   : > { %3224 = vpow2.f32 %v1450_v39  ;;  %v2109_v39 = vld [vmem:[%s3819_s2 + $0x14] sm:$0xf] }
 0x2b9   : > { %3226 = vpow2.f32 %v1448_v40 }
 0x2ba   : > { %v3655_v41 = vpop.eup %3220 }
 0x2bb   : > { %v1462_v42 = vsel %vm1407_vm3, %v3655_v41, 0.0 }
 0x2bc   : > { %1463 = vadd.xlane.f32.xlu1 %v1462_v42  ;;  %v2111_v42 = vld [vmem:[%s3819_s2 + $0x1c] sm:$0xf] }
 0x2bd   : > { %v1431_v43 = vpop.xlane.xlu0 %1430  ;;  %v1428_v44 = vpop.xlane.xlu1 %1427 }
 0x2be   : > { %v3659_v45 = vpop.eup %3222  ;;  %v1439_v48 = vsub.f32 %v1403_v14, %v1431_v43  ;;  %v1438_v49 = vsub.f32 %v1326_v13, %v1428_v44  ;;  %v2110_v44 = vld [vmem:[%s3819_s2 + $0x18] sm:$0xf] }
 0x2bf   : > { %v1465_v50 = vsel %vm1407_vm3, %v3659_v45, 0.0 }
 0x2c0   : > { %v1454_v51 = vmul.f32 1.442695, %v1439_v48  ;;  %v1452_v52 = vmul.f32 1.442695, %v1438_v49  ;;  %1466 = vadd.xlane.f32.xlu0 %v1465_v50 }
 0x2c1   : > { %v1573_v53 = vpop.permute.xlu0 %1572  ;;  %v1497_v54 = vpop.permute.xlu1 %1496 }
 0x2c2   : > { %3228 = vpow2.f32 %v1454_v51  ;;  %3094 = vmatpush3.msra.mxu0 %v1497_v54  ;;  %3099 = vmatpush3.msra.mxu1 %v1573_v53 }
 0x2c3   : > { %3230 = vpow2.f32 %v1452_v52  ;;  %3103 = vmatprep.subr.mxu0 %v3310_v2  ;;  %3108 = vmatprep.subr.mxu1 %v3310_v2 }
 0x2c5   : > { %v3225_v55 = vpop.eup %3224  ;;  %v1649_v63 = vpop.permute.xlu1 %1648 }
 0x2c6   : > { %v3227_v56 = vpop.eup %3226  ;;  %v1471_v57 = vsel %vm1407_vm3, %v3225_v55, 0.0  ;;  %v1801_v3 = vpop.permute.xlu0 %1800 }
 0x2c7   : > { %1472 = vadd.xlane.f32.xlu0 %v1471_v57  ;;  %v1468_v58 = vsel %vm1407_vm3, %v3227_v56, 0.0 }
 0x2c8   : > { %1469 = vadd.xlane.f32.xlu1 %v1468_v58 }
 0x2c9   : > { %v1725_v0 = vpop.permute.xlu1 %1724 }
 0x2cd   : > { %v1877_v1 = vpop.permute.xlu1 %1876 }
 0x2cf   : > { %v3667_v59 = vpop.eup %3228 }
 0x2d0   : > { %v3669_v60 = vpop.eup %3230  ;;  %v1477_v61 = vsel %vm1407_vm3, %v3667_v59, 0.0 }
 0x2d1   : > { %1478 = vadd.xlane.f32.xlu0 %v1477_v61  ;;  %v1474_v62 = vsel %vm1407_vm3, %v3669_v60, 0.0 }
 0x2d2   : > { %1475 = vadd.xlane.f32.xlu1 %v1474_v62 }
 0x2e3   : > { %2028 = vrot.lane.b32.xlu1 %v3581_v47, %s3313_s29 }
 0x2e7   : > { %1952 = vrot.lane.b32.xlu0 %v3579_v46, %s3313_s29  ;;  %s186_s29 = sand.u32 1, %s3300_s16  }
 0x2e8   : > { %s2822_s30 = sshll.u32 %s186_s29, 3  ;;  %s2746_s13 = scalar_lea.sflag [#allocation3], %s186_s29 }
 0x2e9   : > { %s188_s8 = scalar_lea.vmem [#allocation2], %s2822_s30 }
 0x2ea   : > { %s2759_s9 = sshll.u32 %s188_s8, 4  ;;  %s2760_s9 = int_to_ptr.vmem [resolvable:$true] %s2759_s9 }
 0x2eb   : > { %s3248_s14 = scalar_lea.vmem %s2760_s9, 128  ;;  %p3255_p0 = scmp.lt.s32.totalorder %s2760_s9, %s3253_s22 }
 0x2ec   : > { %p3249_p11 = scmp.ne.s32.totalorder %s2760_s9, %s3248_s14  ;;  %p3256_p1 = scmp.lt.s32.totalorder %s3254_s19, %s3248_s14 }
 0x2ee   : > { %p3250_p12 = pnand %p3249_p11, %p3378_p5  ;;  %p3257_p2 = por %p3256_p1, %p3255_p0 }
 0x2f0   : > { %p3251_p13 = pneg %p3250_p12 }
 0x2f2   : > { %p3258_p3 = pnand %p3257_p2, %p3251_p13 }
 0x33b   : > { %v1458_v4 = vpop.xlane.xlu1 %1457 }
 0x33c   : > { %3232 = vrcp.f32 %v1458_v4 }
 0x33f   : > { %v1461_v5 = vpop.xlane.xlu0 %1460 }
 0x340   : > { %3234 = vrcp.f32 %v1461_v5 }
 0x345   : > { %v1464_v6 = vpop.xlane.xlu1 %1463 }
 0x346   : > { %3236 = vrcp.f32 %v1464_v6 }
 0x349   : > { %v3233_v7 = vpop.eup %3232  ;;  %v1467_v8 = vpop.xlane.xlu0 %1466 }
 0x34a   : > { %3238 = vrcp.f32 %v1467_v8  ;;  %v1481_v9 = vmul.f32 %v3233_v7, %v3217_v31 }
 0x34c   : > { %3096 = vmatmul.mubr.msk.f32.vlgmr.msra.gmra.mxu0 %vm1407_vm3, %v1481_v9 }
 0x34d   : > { %v3235_v47 = vpop.eup %3234  ;;  %3104 = vmatpush3.msra.mxu0 %v1649_v63  ;;  %3105 = vmatprep.mubr.msk.f32.mxu0 %vm3311_vm1, %v3310_v2 }
 0x34e   : > { %v1483_v46 = vmul.f32 %v3235_v47, %v3219_v35  ;;  %3113 = vmatprep.subr.mxu0 %v3310_v2 }
 0x350   : > { %v1473_v10 = vpop.xlane.xlu0 %1472  ;;  %3101 = vmatmul.mubr.msk.f32.vlgmr.msra.gmra.mxu1 %vm1407_vm3, %v1483_v46 }
 0x351   : > { %3240 = vrcp.f32 %v1473_v10  ;;  %v1470_v11 = vpop.xlane.xlu1 %1469  ;;  %3109 = vmatpush3.msra.mxu1 %v1725_v0  ;;  %3110 = vmatprep.mubr.msk.f32.mxu1 %vm3311_vm1, %v3310_v2 }
 0x352   : > { %3242 = vrcp.f32 %v1470_v11  ;;  %3118 = vmatprep.subr.mxu1 %v3310_v2 }
 0x353   : > { %v3237_v12 = vpop.eup %3236 }
 0x354   : > { %v1485_v13 = vmul.f32 %v3237_v12, %v3655_v41 }
 0x356   : > { %3106 = vmatmul.mubr.msk.f32.vlgmr.msra.gmra.mxu0 %vm1407_vm3, %v1485_v13 }
 0x357   : > { %v3239_v14 = vpop.eup %3238  ;;  %3114 = vmatpush3.msra.mxu0 %v1801_v3  ;;  %3115 = vmatprep.mubr.msk.f32.mxu0 %vm3311_vm1, %v3310_v2 }
 0x358   : > { %v1487_v15 = vmul.f32 %v3239_v14, %v3659_v45  ;;  %3123 = vmatprep.subr.mxu0 %v3310_v2 }
 0x35a   : > { %v1479_v16 = vpop.xlane.xlu0 %1478  ;;  %3111 = vmatmul.mubr.msk.f32.vlgmr.msra.gmra.mxu1 %vm1407_vm3, %v1487_v15 }
 0x35b   : > { %3244 = vrcp.f32 %v1479_v16  ;;  %v1476_v17 = vpop.xlane.xlu1 %1475  ;;  %3119 = vmatpush3.msra.mxu1 %v1877_v1  ;;  %3120 = vmatprep.mubr.msk.f32.mxu1 %vm3311_vm1, %v3310_v2 }
 0x35c   : > { %3246 = vrcp.f32 %v1476_v17  ;;  %3128 = vmatprep.subr.mxu1 %v3310_v2 }
 0x35e   : > { %v3241_v18 = vpop.eup %3240  ;;  %v1953_v23 = vpop.permute.xlu0 %1952 }
 0x35f   : > { %v3243_v19 = vpop.eup %3242  ;;  %v1491_v20 = vmul.f32 %v3241_v18, %v3225_v55  ;;  %v2029_v22 = vpop.permute.xlu1 %2028  ;;  %v2872_v18 = vld [vmem:[%s3820_s3] ss:$0 sm:$0xff] }
 0x360   : > { %v1489_v21 = vmul.f32 %v3243_v19, %v3227_v56 }
 0x361   : > { %3121 = vmatmul.mubr.msk.f32.vlgmr.msra.gmra.mxu1 %vm1407_vm3, %v1491_v20 }
 0x362   : > { %3116 = vmatmul.mubr.msk.f32.vlgmr.msra.gmra.mxu0 %vm1407_vm3, %v1489_v21  ;;  %3129 = vmatpush3.msra.mxu1 %v2029_v22 }
 0x363   : > { %3124 = vmatpush3.msra.mxu0 %v1953_v23  ;;  %3125 = vmatprep.mubr.msk.f32.mxu0 %vm3311_vm1, %v3310_v2 }
 0x364   : > { %3130 = vmatprep.mubr.msk.f32.mxu1 %vm3311_vm1, %v3310_v2  ;;  %3133 = vmatprep.subr.mxu0 %v3310_v2 }
 0x365   : > { %3138 = vmatprep.subr.mxu1 %v3310_v2 }
 0x368   : > { %v3245_v24 = vpop.eup %3244 }
 0x369   : > { %v3247_v25 = vpop.eup %3246  ;;  %v1495_v26 = vmul.f32 %v3245_v24, %v3667_v59 }
 0x36a   : > { %v1493_v27 = vmul.f32 %v3247_v25, %v3669_v60 }
 0x36b   : > { %3131 = vmatmul.mubr.msk.f32.vlgmr.msra.gmra.mxu1 %vm1407_vm3, %v1495_v26 }
 0x36c   : > { %3126 = vmatmul.mubr.msk.f32.vlgmr.msra.gmra.mxu0 %vm1407_vm3, %v1493_v27  ;;  %3140 = vmatprep.mubr.msk.f32.mxu1 %vm3311_vm1, %v3310_v2 }
 0x36d   : > { %3135 = vmatprep.mubr.msk.f32.mxu0 %vm3311_vm1, %v3310_v2  ;;  %3134 = vmatpush3.msk.msra.mxu0 %vm2115_vm4, %v2104_v28 }
 0x36e   : > { %3143 = vmatprep.subr.mxu0 %v3310_v2  ;;  %3139 = vmatpush3.msk.msra.mxu1 %vm2115_vm4, %v2105_v29 }
 0x36f   : > { %3148 = vmatprep.subr.mxu1 %v3310_v2 }
 0x40c   : > { %v1568_v31 = vpop.f32.mrf.mxu0 }
 0x40d   : > { %3136 = vmatmul.mubr.msk.f32.vlgmr.msra.gmra.mxu0 %vm793_vm2, %v1568_v31 }
 0x40e   : > { %v3097_v32 = vpop.f32.mrf.mxu0  ;;  %3144 = vmatpush3.msk.msra.mxu0 %vm2115_vm4, %v2106_v30  ;;  %3145 = vmatprep.mubr.msk.f32.mxu0 %vm3311_vm1, %v3310_v2 }
 0x40f   : > { %3153 = vmatprep.subr.mxu0 %v3310_v2 }
 0x410   : > { %v1644_v34 = vpop.f32.mrf.mxu1 }
 0x411   : > { %3141 = vmatmul.mubr.msk.f32.vlgmr.msra.gmra.mxu1 %vm793_vm2, %v1644_v34 }
 0x412   : > { %v3102_v35 = vpop.f32.mrf.mxu1  ;;  %3149 = vmatpush3.msk.msra.mxu1 %vm2115_vm4, %v2107_v33  ;;  %3150 = vmatprep.mubr.msk.f32.mxu1 %vm3311_vm1, %v3310_v2 }
 0x413   : > { %3158 = vmatprep.subr.mxu1 %v3310_v2 }
 0x416   : > { %v1720_v37 = vpop.f32.mrf.mxu0 }
 0x417   : > { %3146 = vmatmul.mubr.msk.f32.vlgmr.msra.gmra.mxu0 %vm793_vm2, %v1720_v37 }
 0x418   : > { %v3107_v38 = vpop.f32.mrf.mxu0  ;;  %3154 = vmatpush3.msk.msra.mxu0 %vm2115_vm4, %v2108_v36  ;;  %3155 = vmatprep.mubr.msk.f32.mxu0 %vm3311_vm1, %v3310_v2 }
 0x419   : > { %3163 = vmatprep.subr.mxu0 %v3310_v2 }
 0x41a   : > { %v1796_v40 = vpop.f32.mrf.mxu1 }
 0x41b   : > { %3151 = vmatmul.mubr.msk.f32.vlgmr.msra.gmra.mxu1 %vm793_vm2, %v1796_v40 }
 0x41c   : > { %v3112_v41 = vpop.f32.mrf.mxu1  ;;  %3159 = vmatpush3.msk.msra.mxu1 %vm2115_vm4, %v2109_v39  ;;  %3160 = vmatprep.mubr.msk.f32.mxu1 %vm3311_vm1, %v3310_v2 }
 0x41d   : > { %3168 = vmatprep.subr.mxu1 %v3310_v2 }
 0x421   : > { %v1948_v43 = vpop.f32.mrf.mxu1 }
 0x422   : > { %v1872_v45 = vpop.f32.mrf.mxu0  ;;  %3161 = vmatmul.mubr.msk.f32.vlgmr.msra.gmra.mxu1 %vm793_vm2, %v1948_v43 }
 0x423   : > { %3156 = vmatmul.mubr.msk.f32.vlgmr.msra.gmra.mxu0 %vm793_vm2, %v1872_v45  ;;  %v3122_v48 = vpop.f32.mrf.mxu1  ;;  %3169 = vmatpush3.msk.msra.mxu1 %vm2115_vm4, %v2111_v42 }
 0x424   : > { %v3117_v49 = vpop.f32.mrf.mxu0  ;;  %3164 = vmatpush3.msk.msra.mxu0 %vm2115_vm4, %v2110_v44  ;;  %3165 = vmatprep.mubr.msk.f32.mxu0 %vm3311_vm1, %v3310_v2 }
 0x425   : > { %3170 = vmatprep.mubr.msk.f32.mxu1 %vm3311_vm1, %v3310_v2 }
 0x42b   : > { %v2100_v50 = vpop.f32.mrf.mxu1 }
 0x42c   : > { %v2024_v51 = vpop.f32.mrf.mxu0  ;;  %3171 = vmatmul.mubr.msk.f32.vlgmr.msra.gmra.mxu1 %vm793_vm2, %v2100_v50 }
 0x42d   : > { %3166 = vmatmul.mubr.msk.f32.vlgmr.msra.gmra.mxu0 %vm793_vm2, %v2024_v51  ;;  %v3132_v52 = vpop.f32.mrf.mxu1 }
 0x42e   : > { %v3127_v53 = vpop.f32.mrf.mxu0 }
 0x4cd   : > { %v2185_v54 = vpop.f32.mrf.mxu0 }
 0x4ce   : > { %v2721_v2 = vsel %vm226_vm0, %v2185_v54, 0.0 }
 0x4cf   : > { %v3137_v55 = vpop.f32.mrf.mxu0 }
 0x4d1   : > { %v2261_v56 = vpop.f32.mrf.mxu1 }
 0x4d2   : > { %v2722_v62 = vsel %vm226_vm0, %v2261_v56, 0.0 }
 0x4d3   : > { %v3142_v57 = vpop.f32.mrf.mxu1  ;;  %v2723_v1 = vadd.f32 %v2722_v62, %v2721_v2 }
 0x4d7   : > { %v2337_v58 = vpop.f32.mrf.mxu0 }
 0x4d8   : > { %v2724_v63 = vsel %vm226_vm0, %v2337_v58, 0.0 }
 0x4d9   : > { %v3147_v59 = vpop.f32.mrf.mxu0  ;;  %v2725_v6 = vadd.f32 %v2724_v63, %v2723_v1 }
 0x4db   : > { %v2413_v60 = vpop.f32.mrf.mxu1 }
 0x4dc   : > { %v2726_v4 = vsel %vm226_vm0, %v2413_v60, 0.0 }
 0x4dd   : > { %v3152_v61 = vpop.f32.mrf.mxu1  ;;  %v2727_v9 = vadd.f32 %v2726_v4, %v2725_v6 }
 0x4e2   : > { %v2565_v0 = vpop.f32.mrf.mxu1 }
 0x4e3   : > { %v2489_v3 = vpop.f32.mrf.mxu0  ;;  %v2730_v46 = vsel %vm226_vm0, %v2565_v0, 0.0 }
 0x4e4   : > { %v3162_v5 = vpop.f32.mrf.mxu1  ;;  %v2728_v8 = vsel %vm226_vm0, %v2489_v3, 0.0 }
 0x4e5   : > { %v3157_v7 = vpop.f32.mrf.mxu0  ;;  %v2729_v47 = vadd.f32 %v2728_v8, %v2727_v9 }
 0x4e7   : > { %v2731_v11 = vadd.f32 %v2730_v46, %v2729_v47 }
 0x4ec   : > { %v2717_v10 = vpop.f32.mrf.mxu1 }
 0x4ed   : > { %v2641_v12 = vpop.f32.mrf.mxu0  ;;  %v2734_v17 = vsel %vm226_vm0, %v2717_v10, 0.0 }
 0x4ee   : > { %v2732_v13 = vsel %vm226_vm0, %v2641_v12, 0.0  ;;  %v3172_v14 = vpop.f32.mrf.mxu1 }
 0x4ef   : > { %v2733_v15 = vadd.f32 %v2732_v13, %v2731_v11  ;;  %v3167_v16 = vpop.f32.mrf.mxu0 }
 0x4f1   : > { %v2735_v19 = vadd.f32 %v2734_v17, %v2733_v15 }
 0x4f3   : > { %v2743_v20 = vadd.f32 %v2872_v18, %v2735_v19 }
 0x4f5   : > { %2744 = vst.msk [vmem:[%s188_s8] sm:$0xff] %vm226_vm0, %v2743_v20 }
 0x4f6   : > { %3261 = shalt.err (!%p3258_p3)
}
 0x4f7   : > { %s3262_s23 = scalar_lea.hbm %s2757_s12, 128  ;;  %s3266_s29 = scalar_lea.hbm %s3821_s4, 256 }
 0x4f8   : > { %p3263_p4 = scmp.ne.s32.totalorder %s2757_s12, %s3262_s23  ;;  %p3267_p9 = scmp.lt.s32.totalorder %s2757_s12, %s3821_s4 }
 0x4f9   : > { %p3268_p10 = scmp.lt.s32.totalorder %s3266_s29, %s3262_s23 }
 0x4fa   : > { %p3264_p7 = pnand %p3263_p4, %p3378_p5 }
 0x4fb   : > { %p3269_p11 = por %p3268_p10, %p3267_p9 }
 0x4fc   : > { %p3265_p8 = pneg %p3264_p7 }
 0x4fe   : > { %p3270_p12 = pnand %p3269_p11, %p3265_p8 }
 0x500   : > { %3273 = shalt.err (!%p3270_p12)
}
 0x501   : > { %3173 = dma.vmem_to_hbm [thread:$0]  (%p3378_p5), %s2760_s9, 128, %s2757_s12, %s2746_s13  }
 0x502 PF: > { %p3179_p13 = scmp.ge.s32.totalorder %s3308_s18, 2  ;;  %s2771_s6 = sand.u32 1, %s3296_s15  }
 0x503   : > { %s2772_s7 = scalar_lea.sflag [#allocation3], %s2771_s6 }
 0x504   : > { %p3176_p0 = pnand %p3179_p13, %p3382_p6 }
 0x506   : > { %p3177_p1 = pneg %p3176_p0 }
 0x508   : > { %3291 = dma.done.wait (%p3177_p1), %s2772_s7, 128  }
 0x509   : > { %3293 = vsyncadd (%p3177_p1), %s2772_s7, 4294967168  ;;  %p14_p2 = scmp.ge.s32.totalorder %s3365_s21, 4   ;;  %s3824_s15 = smov %s3300_s16 }
 0x50a   : > { %s3825_s16 = smov %s3304_s17  ;;  %s3826_s17 = smov %s3376_s24 }
 0x50b   : > { %s3827_s18 = smov %s3365_s21  ;;  %16 = sbr.rel (!%p14_p2) target bundleno = 3 (0x3), region = 71 }
 0x510   :  { %2777 = vsyncpa [#allocation3], 1 }
 0x511   :  { %2779 = vsyncpa [#allocation3 + $0x1], 1 }

</bundles_post_ra>
